<compile_context>
chip_gen: v7x
topology: tpu7x:2x2x1
jax: 0.10.0
libtpu: 0.0.40
codegen_flags: <defaults>
</compile_context>

<pallas_src>
import jax
import jax.numpy as jnp
from jax.experimental import pallas as pl
from jax.experimental.pallas import tpu as pltpu

BN_EPS = 1e-5


def readout_kernel(x_ref, w_ref, bias_ref, o_ref, acc_ref):
    """x_ref: (tb, tn, D)  w_ref: (D, Hp)  bias_ref: (1, Hp)  o_ref: (tb, Hp)
       acc_ref: VMEM (tb, D) accumulator for the node-sum of x."""
    j = pl.program_id(1)

    @pl.when(j == 0)
    def _():
        acc_ref[...] = jnp.zeros_like(acc_ref)

    # Node-axis reduction of this x tile (Dropout(eval) + Linear commute with the sum).
    acc_ref[...] += jnp.sum(x_ref[...], axis=1)          # (tb, D)

    @pl.when(j == pl.num_programs(1) - 1)
    def _():
        # Folded Linear + bias + BatchNorm(eval): relu(xs @ W' + bias')
        s = jnp.dot(acc_ref[...], w_ref[...],
                    preferred_element_type=jnp.float32)  # (tb, Hp)
        o_ref[...] = jnp.maximum(s + bias_ref[...], 0.0)


def _pick_tile(dim, cap):
    """Largest tile <= cap that is either the full dim or a multiple of 8 dividing dim."""
    if dim <= cap:
        return dim
    t = (cap // 8) * 8
    while t >= 8:
        if dim % t == 0:
            return t
        t -= 8
    return dim


def readout_forward(x, w, b, gamma, beta, running_mean, running_var,
                    *, block_b=512, block_n=512):
    B, N, D = x.shape
    H = w.shape[1]

    # ---- one-time parameter folding (outside the hot path) ----
    scale = gamma * jax.lax.rsqrt(running_var + BN_EPS)          # (1, H)
    w_folded = w * scale                                         # (D, H)
    bias_folded = (N * b) * scale + beta - running_mean * scale  # (1, H)

    # Lane-dense output: pad H up to a multiple of 128 (zeros -> relu(0)=0, sliced off).
    Hp = 128 * pl.cdiv(H, 128)
    if Hp != H:
        w_folded = jnp.pad(w_folded, ((0, 0), (0, Hp - H)))
        bias_folded = jnp.pad(bias_folded, ((0, 0), (0, Hp - H)))

    tb = _pick_tile(B, block_b)
    tn = _pick_tile(N, block_n)

    out = pl.pallas_call(
        readout_kernel,
        out_shape=jax.ShapeDtypeStruct((B, Hp), jnp.float32),
        grid_spec=pltpu.PrefetchScalarGridSpec(
            num_scalar_prefetch=0,
            grid=(B // tb, N // tn),
            in_specs=[
                pl.BlockSpec((tb, tn, D), lambda i, j: (i, j, 0)),  # x tile
                pl.BlockSpec((D, Hp), lambda i, j: (0, 0)),         # folded W (resident)
                pl.BlockSpec((1, Hp), lambda i, j: (0, 0)),         # folded bias
            ],
            out_specs=pl.BlockSpec((tb, Hp), lambda i, j: (i, 0)),
            scratch_shapes=[pltpu.VMEM((tb, D), jnp.float32)],
        ),
        compiler_params=pltpu.CompilerParams(
            dimension_semantics=("parallel", "arbitrary")),
    )(x, w_folded, bias_folded)

    return out[:, :H]


def reference_forward(x, w, b, gamma, beta, running_mean, running_var):
    z = jnp.einsum('bnd,dh->bnh', x, w) + b                       # Linear (+ eval dropout)
    s = z.sum(axis=1)                                             # sum over nodes
    y = (s - running_mean) * jax.lax.rsqrt(running_var + BN_EPS) * gamma + beta
    return jnp.maximum(y, 0.0)                                    # ReLU (+ eval dropout)


if __name__ == "__main__":
    # Small shapes: batch=2, nodes(seq)=8, input_dim=16, hidden_dim=32
    B, N, D, H = 2, 8, 16, 32

    key = jax.random.PRNGKey(0)
    kx, kw, kb = jax.random.split(key, 3)

    x = jax.random.normal(kx, (B, N, D), dtype=jnp.float32)

    # fc_hidden parameters (deterministic init)
    w = jax.random.normal(kw, (D, H), dtype=jnp.float32) * (1.0 / D ** 0.5)
    b = jax.random.normal(kb, (1, H), dtype=jnp.float32) * 0.01

    # BatchNorm1d parameters / running stats (fresh PyTorch init)
    gamma = jnp.ones((1, H), dtype=jnp.float32)
    beta = jnp.zeros((1, H), dtype=jnp.float32)
    running_mean = jnp.zeros((1, H), dtype=jnp.float32)
    running_var = jnp.ones((1, H), dtype=jnp.float32)

    out = readout_forward(x, w, b, gamma, beta, running_mean, running_var)
    out = jax.block_until_ready(out)

    ref = reference_forward(x, w, b, gamma, beta, running_mean, running_var)
    assert out.shape == (B, H)
    assert jnp.allclose(out, ref, atol=1e-4, rtol=1e-4), "mismatch vs reference"

    print("KERNEL_OK")
</pallas_src>

<mosaic_0001>
module attributes {stable_mosaic.version = 11 : i64} {
  func.func @readout_kernel(%arg0: i32, %arg1: i32, %arg2: memref<2x8x16xf32, #tpu.memory_space<vmem>>, %arg3: memref<16x128xf32, #tpu.memory_space<vmem>>, %arg4: memref<1x128xf32, #tpu.memory_space<vmem>>, %arg5: memref<2x128xf32, #tpu.memory_space<vmem>>, %arg6: memref<2x16xf32, #tpu.memory_space<vmem>>) attributes {dimension_semantics = [#tpu.dimension_semantics<parallel>, #tpu.dimension_semantics<arbitrary>], iteration_bounds = array<i64: 1, 1>, scalar_prefetch = 0 : i64, scratch_operands = 1 : i64, tpu.core_type = #tpu.core_type<tc>, window_params = [{transform_indices = @transform_0, window_bounds = array<i64: 2, 8, 16>}, {pipeline_mode = #tpu.pipeline_mode<synchronous>, transform_indices = @transform_1, window_bounds = array<i64: 16, 128>}, {pipeline_mode = #tpu.pipeline_mode<synchronous>, transform_indices = @transform_2, window_bounds = array<i64: 1, 128>}, {transform_indices = @transform_3, window_bounds = array<i64: 2, 128>}]} {
    %c0_i32 = arith.constant 0 : i32
    %0 = arith.cmpi eq, %arg1, %c0_i32 : i32
    %1 = arith.extui %0 : i1 to i32
    %c0_i32_0 = arith.constant 0 : i32
    %2 = arith.cmpi ne, %1, %c0_i32_0 : i32
    scf.if %2 {
      %cst_9 = arith.constant 0.000000e+00 : f32
      %11 = vector.broadcast %cst_9 : f32 to vector<2x16xf32>
      %c0_10 = arith.constant 0 : index
      %c0_11 = arith.constant 0 : index
      %12 = vector.load %arg6[%c0_10, %c0_11] : memref<2x16xf32, #tpu.memory_space<vmem>>, vector<2x16xf32>
      tpu.vector_store %arg6[%c0_10, %c0_11], %11 {strides = array<i32>} : memref<2x16xf32, #tpu.memory_space<vmem>>, vector<2x16xf32>,
    } else {
    }
    %c0 = arith.constant 0 : index
    %c0_1 = arith.constant 0 : index
    %3 = vector.load %arg6[%c0, %c0_1] : memref<2x16xf32, #tpu.memory_space<vmem>>, vector<2x16xf32>
    %c0_2 = arith.constant 0 : index
    %c0_3 = arith.constant 0 : index
    %c0_4 = arith.constant 0 : index
    %4 = vector.load %arg2[%c0_2, %c0_3, %c0_4] : memref<2x8x16xf32, #tpu.memory_space<vmem>>, vector<2x8x16xf32>
    %cst = arith.constant dense<0.000000e+00> : vector<2x16xf32>
    %5 = vector.multi_reduction <add>, %4, %cst [1] : vector<2x8x16xf32> to vector<2x16xf32>
    %6 = arith.addf %3, %5 : vector<2x16xf32>
    %c0_5 = arith.constant 0 : index
    %c0_6 = arith.constant 0 : index
    %7 = vector.load %arg6[%c0_5, %c0_6] : memref<2x16xf32, #tpu.memory_space<vmem>>, vector<2x16xf32>
    tpu.vector_store %arg6[%c0_5, %c0_6], %6 {strides = array<i32>} : memref<2x16xf32, #tpu.memory_space<vmem>>, vector<2x16xf32>,
    %c0_i32_7 = arith.constant 0 : i32
    %8 = arith.cmpi eq, %arg1, %c0_i32_7 : i32
    %9 = arith.extui %8 : i1 to i32
    %c0_i32_8 = arith.constant 0 : i32
    %10 = arith.cmpi ne, %9, %c0_i32_8 : i32
    scf.if %10 {
      %c0_9 = arith.constant 0 : index
      %c0_10 = arith.constant 0 : index
      %11 = vector.load %arg6[%c0_9, %c0_10] : memref<2x16xf32, #tpu.memory_space<vmem>>, vector<2x16xf32>
      %c0_11 = arith.constant 0 : index
      %c0_12 = arith.constant 0 : index
      %12 = vector.load %arg3[%c0_11, %c0_12] : memref<16x128xf32, #tpu.memory_space<vmem>>, vector<16x128xf32>
      %cst_13 = arith.constant dense<0.000000e+00> : vector<2x128xf32>
      %13 = tpu.matmul %11, %12, %cst_13 {dimension_numbers = #tpu.dot_dimension_numbers<[1], [0], [0], [1], [0, 0, 1, 1], [], []>} : vector<2x16xf32>, vector<16x128xf32>, vector<2x128xf32> -> vector<2x128xf32>
      %c0_14 = arith.constant 0 : index
      %c0_15 = arith.constant 0 : index
      %14 = vector.load %arg4[%c0_14, %c0_15] : memref<1x128xf32, #tpu.memory_space<vmem>>, vector<1x128xf32>
      %15 = vector.broadcast %14 : vector<1x128xf32> to vector<2x128xf32>
      %16 = arith.addf %13, %15 : vector<2x128xf32>
      %cst_16 = arith.constant 0.000000e+00 : f32
      %17 = vector.broadcast %cst_16 : f32 to vector<2x128xf32>
      %18 = arith.maximumf %16, %17 : vector<2x128xf32>
      %c0_17 = arith.constant 0 : index
      %c0_18 = arith.constant 0 : index
      %19 = vector.load %arg5[%c0_17, %c0_18] : memref<2x128xf32, #tpu.memory_space<vmem>>, vector<2x128xf32>
      tpu.vector_store %arg5[%c0_17, %c0_18], %18 {strides = array<i32>} : memref<2x128xf32, #tpu.memory_space<vmem>>, vector<2x128xf32>,
    } else {
    }
    return
  }
  func.func @transform_0(%arg0: i32, %arg1: i32) -> (i32, i32, i32) {
    %c0_i32 = arith.constant 0 : i32
    %c0_i32_0 = arith.constant 0 : i32
    return %arg0, %arg1, %c0_i32 : i32, i32, i32
  }
  func.func @transform_1(%arg0: i32, %arg1: i32) -> (i32, i32) {
    %c0_i32 = arith.constant 0 : i32
    %c0_i32_0 = arith.constant 0 : i32
    %c0_i32_1 = arith.constant 0 : i32
    return %c0_i32, %c0_i32_0 : i32, i32
  }
  func.func @transform_2(%arg0: i32, %arg1: i32) -> (i32, i32) {
    %c0_i32 = arith.constant 0 : i32
    %c0_i32_0 = arith.constant 0 : i32
    %c0_i32_1 = arith.constant 0 : i32
    return %c0_i32, %c0_i32_0 : i32, i32
  }
  func.func @transform_3(%arg0: i32, %arg1: i32) -> (i32, i32) {
    %c0_i32 = arith.constant 0 : i32
    %c0_i32_0 = arith.constant 0 : i32
    return %arg0, %c0_i32 : i32, i32
  }
}

</mosaic_0001>

<bundles_post_ra>
// kernel: tpu_custom_call.1
= control target key start
LH: loop header
LB: loop body
LE: loop exit
PB: predicated region body
PF: predicated region fallthrough
CT: control target
= control target key end

     0   :  { %8 = vsyncpa [#allocation4], 0  ;;  %s346_s0 = inlined_call_operand.hbm [shape: f32[2,8,16], index: 0, kind: input, shape index: {}]   ;;  %s347_s1 = inlined_call_operand.hbm [shape: f32[16,128], index: 1, kind: input, shape index: {}]   ;;  %s348_s2 = inlined_call_operand.vmem [shape: f32[1,128], index: 2, kind: input, shape index: {}]   ;;  %s349_s3 = inlined_call_operand.hbm [shape: f32[2,128], index: 3, kind: output, shape index: {}]  }
   0x1   :  { %9 = vsyncpa [#allocation7], 0 }
   0x2   :  { %10 = vsyncpa [#allocation5], 0  ;;  %s274_s12 = smov [#allocation3]   ;;  %s202_s16 = scalar_lea.hbm %s346_s0, 256 }
   0x3   :  { %s16_s13 = sshll.u32 %s274_s12, 4  ;;  %p203_p0 = scmp.ne.s32.totalorder %s346_s0, %s202_s16  ;;  %s17_s13 = int_to_ptr.vmem [resolvable:$true] %s16_s13 }
   0x4   :  { %p206_p1 = scmp.lt.u32.totalorder %s202_s16, %s346_s0 }
   0x6   :  { %p208_p2 = pnand %p206_p1, %p203_p0 }
   0x8   :  { %211 = shalt.err (!%p208_p2)
}
   0x9   :  { %s212_s21 = scalar_lea.vmem %s17_s13, 256  ;;  %p217_p4 = scmp.lt.s32.totalorder %s17_s13, %s17_s13 }
   0xa   :  { %p213_p3 = scmp.ne.s32.totalorder %s17_s13, %s212_s21  ;;  %p218_p5 = scmp.lt.s32.totalorder %s212_s21, %s212_s21 }
   0xc   :  { %p219_p6 = por %p218_p5, %p217_p4 }
   0xe   :  { %p220_p7 = pnand %p219_p6, %p213_p3 }
  0x10   :  { %223 = shalt.err (!%p220_p7)
}
  0x11   :  { %s275_s22 = smov 128   ;;  %s276_s23 = smov 8  }
  0x12   :  { %22 = dma.hbm_to_vmem [thread:$0]  %s346_s0, 256, %s17_s13, [#allocation4], %s275_s22, %s275_s22, %s276_s23  }
  0x13   :  { %s277_s26 = smov [#allocation6]   ;;  %s224_s30 = scalar_lea.hbm %s347_s1, 256 }
  0x14   :  { %s28_s27 = sshll.u32 %s277_s26, 4  ;;  %p225_p8 = scmp.ne.s32.totalorder %s347_s1, %s224_s30  ;;  %s29_s27 = int_to_ptr.vmem [resolvable:$true] %s28_s27 }
  0x15   :  { %p228_p9 = scmp.lt.u32.totalorder %s224_s30, %s347_s1 }
  0x17   :  { %p230_p10 = pnand %p228_p9, %p225_p8 }
  0x19   :  { %233 = shalt.err (!%p230_p10)
}
  0x1a   :  { %s234_s8 = scalar_lea.vmem %s29_s27, 256  ;;  %p239_p12 = scmp.lt.s32.totalorder %s29_s27, %s29_s27 }
  0x1b   :  { %p235_p11 = scmp.ne.s32.totalorder %s29_s27, %s234_s8  ;;  %p240_p13 = scmp.lt.s32.totalorder %s234_s8, %s234_s8 }
  0x1d   :  { %p241_p0 = por %p240_p13, %p239_p12 }
  0x1f   :  { %p242_p1 = pnand %p241_p0, %p235_p11 }
  0x21   :  { %245 = shalt.err (!%p242_p1)
}
  0x22   :  { %34 = dma.hbm_to_vmem [thread:$0]  %s347_s1, 256, %s29_s27, [#allocation7], %s275_s22, %s275_s22, %s276_s23  }
  0x23   :  { %268 = dma.done.wait [#allocation4], 256  }
  0x24   :  { %269 = vsyncadd [#allocation4], 4294967040 }
  0x25   :  { %270 = dma.done.wait [#allocation7], 256  }
  0x26   :  { %271 = vsyncadd [#allocation7], 4294967040  ;;  %vm47_vm0 = vcmask 123904   ;;  %v278_v0 = vmov 0.0|0.0   ;;  %v279_v1 = vmov 0.0   ;;  %vm280_vm1 = vmmov 0  }
  0x27   :  { %191 = vmatprep.subr.bf16.mxu0 %v278_v0  ;;  %48 = vst.msk [vmem:[#allocation2] sm:$0x3] %vm47_vm0, %v279_v1  ;;  %188 = vmatprep.mubr.msk.f32.mxu0 %vm280_vm1, %v279_v1  ;;  %vm52_vm2 = vcmask 130048   ;;  %v79_v2 = vld [vmem:[#allocation6] sm:$0xff]  ;;  %v80_v3 = vld [vmem:[#allocation6 + $0x8] sm:$0xff]  ;;  %v50_v4 = vld [vmem:[#allocation3] sm:$0xff] }
  0x28   :  { %v192_v5 = vpack.c.bf16 %v80_v3, %v79_v2  ;;  %v51_v6 = vld [vmem:[#allocation3 + $0x8] sm:$0xff]  ;;  %v53_v7 = vsel %vm52_vm2, %v50_v4, 0.0  ;;  %vm69_vm3 = vcmask 1041409   ;;  %v179_v25 = vld [vmem:[%s348_s2] ss:$0 sm:$0xff]  ;;  %s281_s11 = smov [#allocation8]  }
  0x29   :  { %v54_v8 = vrot.slane %v53_v7, 4  ;;  %v60_v9 = vsel %vm52_vm2, %v51_v6, 0.0  ;;  %s169_s12 = sshll.u32 %s281_s11, 4  ;;  %s170_s12 = int_to_ptr.vmem [resolvable:$true] %s169_s12 }
  0x2a   :  { %193 = vmatpush3.bf16.msra.mxu0 %v192_v5  ;;  %v61_v10 = vrot.slane %v60_v9, 4  ;;  %s246_s13 = scalar_lea.vmem %s170_s12, 32  ;;  %p251_p3 = scmp.lt.s32.totalorder %s170_s12, %s170_s12 }
  0x2b   :  { %v55_v11 = vadd.f32 %v54_v8, %v53_v7  ;;  %p247_p2 = scmp.ne.s32.totalorder %s170_s12, %s246_s13  ;;  %p252_p4 = scmp.lt.s32.totalorder %s246_s13, %s246_s13 }
  0x2c   :  { %v62_v12 = vadd.f32 %v61_v10, %v60_v9 }
  0x2d   :  { %v56_v13 = vrot.slane %v55_v11, 2  ;;  %p253_p5 = por %p252_p4, %p251_p3 }
  0x2e   :  { %v63_v14 = vrot.slane %v62_v12, 2  ;;  %v49_v20 = vld [vmem:[#allocation2] sm:$0x3] }
  0x2f   :  { %v57_v15 = vadd.f32 %v56_v13, %v55_v11  ;;  %p254_p6 = pnand %p253_p5, %p247_p2 }
  0x30   :  { %v64_v16 = vadd.f32 %v63_v14, %v62_v12 }
  0x31   :  { %v58_v17 = vrot.slane %v57_v15, 1 }
  0x32   :  { %v65_v18 = vrot.slane %v64_v16, 1 }
  0x33   :  { %v59_v19 = vadd.f32 %v58_v17, %v57_v15 }
  0x34   :  { %v66_v21 = vadd.f32 %v65_v18, %v64_v16 }
  0x36   :  { %v70_v22 = vsel %vm69_vm3, %v66_v21, %v59_v19 }
  0x37   :  { %v72_v23 = vadd.f32 %v70_v22, %v49_v20 }
  0x39   :  { %74 = vst.msk [vmem:[#allocation2] sm:$0x3] %vm47_vm0, %v72_v23 }
  0x40   :  { %v78_v24 = vld [vmem:[#allocation2] sm:$0x3] }
  0x41   :  { %189 = vmatmul.mubr.msk.f32.vlgmr.msra.gmra.mrb[0].mxu0 %vm52_vm2, %v78_v24 }
 0x114   :  { %v157_v26 = vpop.f32.mrb[0].mxu0 }
 0x115   :  { %v158_v27 = vadd.f32 %v179_v25, %v157_v26  ;;  %v190_v28 = vpop.f32.mrb[1].mxu0 }
 0x117   :  { %v161_v29 = vmax.f32 %v158_v27, 0.0 }
 0x119   :  { %162 = vst [vmem:[#allocation8] sm:$0x3] %v161_v29 }
 0x11a   :  { %257 = shalt.err (!%p254_p6)
}
 0x11b   :  { %s258_s16 = scalar_lea.hbm %s349_s3, 32 }
 0x11c   :  { %p259_p7 = scmp.ne.s32.totalorder %s349_s3, %s258_s16  ;;  %p262_p8 = scmp.lt.u32.totalorder %s258_s16, %s349_s3 }
 0x11e   :  { %p264_p9 = pnand %p262_p8, %p259_p7 }
 0x120   :  { %267 = shalt.err (!%p264_p9)
}
 0x121   :  { %172 = dma.vmem_to_hbm [thread:$0]  %s170_s12, 32, %s349_s3, [#allocation5]  }
 0x122   :  { %272 = dma.done.wait [#allocation5], 32  }
 0x123   :  { %273 = vsyncadd [#allocation5], 4294967264 }
 0x124   :  { %176 = vsyncpa [#allocation4], 1 }
 0x125   :  { %177 = vsyncpa [#allocation7], 1 }
 0x126   :  { %178 = vsyncpa [#allocation5], 1 }

</bundles_post_ra>
